<compile_context>
chip_gen: v5e
topology: v5e:2x2
jax: 0.10.0
libtpu: 0.0.40
codegen_flags: <defaults>
</compile_context>

<pallas_src>
import jax
import jax.numpy as jnp
from jax.experimental import pallas as pl
from jax.experimental.pallas import tpu as pltpu


def _round_up(x, m):
    return ((x + m - 1) // m) * m


def _critic_kernel(s_ref, a_ref, w1s_ref, w1a_ref, b1_ref, w2_ref, b2_ref,
                   w3_ref, b3_ref, o_ref):
    cdt = w1s_ref.dtype  # compute dtype for MXU operands (f32 or bf16)
    s = s_ref[...].astype(cdt)                                   # [Bt, Ds]
    a = a_ref[...].astype(cdt)                                   # [Bt, Da]

    # Layer 1: split matmul (concat done implicitly), f32 accumulation.
    h1 = (jnp.dot(s, w1s_ref[...], preferred_element_type=jnp.float32)
          + jnp.dot(a, w1a_ref[...], preferred_element_type=jnp.float32)
          + b1_ref[...])
    h1 = jnp.maximum(h1, 0.0)                                    # ReLU in f32 (VPU)

    # Layer 2.
    h2 = jnp.dot(h1.astype(cdt), w2_ref[...],
                 preferred_element_type=jnp.float32) + b2_ref[...]
    h2 = jnp.maximum(h2, 0.0)

    # Layer 3 (H -> 1): VPU multiply + lane reduction instead of an N=1 MXU
    # matmul (avoids wasting 255/256 of the MXU columns).
    q = jnp.sum(h2 * w3_ref[...], axis=-1, keepdims=True) + b3_ref[...]
    o_ref[...] = q.astype(o_ref.dtype)                           # [Bt, 1]


def prepare_params(params, state_dim, *, compute_dtype=jnp.float32):
    """Split / reshape / cast torch-layout params once, outside the hot path."""
    w1, b1, w2, b2, w3, b3 = params
    w1s = w1[:state_dim].astype(compute_dtype)        # [Ds, H]
    w1a = w1[state_dim:].astype(compute_dtype)        # [Da, H]
    b1 = b1.reshape(1, -1).astype(jnp.float32)        # [1, H]
    w2 = w2.astype(compute_dtype)                     # [H, H]
    b2 = b2.reshape(1, -1).astype(jnp.float32)        # [1, H]
    w3_row = w3.reshape(1, -1).astype(jnp.float32)    # [1, H]  (VPU path, keep f32)
    b3 = b3.reshape(1, 1).astype(jnp.float32)         # [1, 1]
    return (w1s, w1a, b1, w2, b2, w3_row, b3)


def ddpg_critic_forward(state, action, prepared_params, *, block_b=512):
    """state: [B, obs+goal], action: [B, act] -> Q: [B, 1] (f32)."""
    w1s, w1a, b1, w2, b2, w3_row, b3 = prepared_params
    B, Ds = state.shape
    Da = action.shape[1]
    H = w2.shape[0]

    # Batch tile: multiple of 8 (f32 sublane); pad B so the tile divides it.
    bt = min(block_b, _round_up(B, 8))
    b_pad = _round_up(B, bt)
    if b_pad != B:
        pad = b_pad - B
        state = jnp.pad(state, ((0, pad), (0, 0)))
        action = jnp.pad(action, ((0, pad), (0, 0)))

    grid = (pl.cdiv(b_pad, bt),)

    out = pl.pallas_call(
        _critic_kernel,
        out_shape=jax.ShapeDtypeStruct((b_pad, 1), jnp.float32),
        grid=grid,
        in_specs=[
            pl.BlockSpec((bt, Ds), lambda i: (i, 0)),   # state tile
            pl.BlockSpec((bt, Da), lambda i: (i, 0)),   # action tile
            pl.BlockSpec((Ds, H), lambda i: (0, 0)),    # W1[:Ds]   (resident)
            pl.BlockSpec((Da, H), lambda i: (0, 0)),    # W1[Ds:]   (resident)
            pl.BlockSpec((1, H), lambda i: (0, 0)),     # b1        (resident)
            pl.BlockSpec((H, H), lambda i: (0, 0)),     # W2        (resident)
            pl.BlockSpec((1, H), lambda i: (0, 0)),     # b2        (resident)
            pl.BlockSpec((1, H), lambda i: (0, 0)),     # W3 row    (resident)
            pl.BlockSpec((1, 1), lambda i: (0, 0)),     # b3        (resident)
        ],
        out_specs=pl.BlockSpec((bt, 1), lambda i: (i, 0)),
        compiler_params=pltpu.CompilerParams(
            dimension_semantics=("parallel",)),
    )(state, action, w1s, w1a, b1, w2, b2, w3_row, b3)

    return out[:B]


def init_params(key, input_dim, hidden_dim=256, output_dim=1):
    """Deterministic init mimicking nn.Linear default (uniform +/- 1/sqrt(fan_in))."""
    ks = jax.random.split(key, 6)

    def lin(kw, kb, fan_in, fan_out):
        bound = 1.0 / jnp.sqrt(jnp.float32(fan_in))
        w = jax.random.uniform(kw, (fan_in, fan_out), jnp.float32, -bound, bound)
        b = jax.random.uniform(kb, (1, fan_out), jnp.float32, -bound, bound)
        return w, b

    w1, b1 = lin(ks[0], ks[1], input_dim, hidden_dim)
    w2, b2 = lin(ks[2], ks[3], hidden_dim, hidden_dim)
    w3, b3 = lin(ks[4], ks[5], hidden_dim, output_dim)
    return (w1, b1, w2, b2, w3, b3)


def critic_reference(state, action, params):
    w1, b1, w2, b2, w3, b3 = params
    x = jnp.concatenate([state, action], axis=-1)
    h = jnp.maximum(x @ w1 + b1, 0.0)
    h = jnp.maximum(h @ w2 + b2, 0.0)
    return h @ w3 + b3


if __name__ == "__main__":
    # env_params: obs=10, goal=3, action=4 -> input_dim=17
    obs_dim, goal_dim, act_dim = 10, 3, 4
    state_dim = obs_dim + goal_dim
    input_dim = state_dim + act_dim

    key = jax.random.PRNGKey(0)
    k_state, k_action, k_params = jax.random.split(key, 3)
    params = init_params(k_params, input_dim)

    # --- small-batch f32 check (single tile) ---
    batch = 8
    state = jax.random.normal(k_state, (batch, state_dim), jnp.float32)
    action = jax.random.normal(k_action, (batch, act_dim), jnp.float32)

    p_f32 = prepare_params(params, state_dim, compute_dtype=jnp.float32)
    q = jax.block_until_ready(ddpg_critic_forward(state, action, p_f32))
    ref = critic_reference(state, action, params)
    assert q.shape == (batch, 1)
    assert jnp.allclose(q, ref, atol=1e-4, rtol=1e-4)

    # --- larger, non-divisible batch with bf16 operands (multi-tile grid +
    #     tail padding + f32 accumulation) ---
    batch2 = 300
    k_s2, k_a2 = jax.random.split(jax.random.PRNGKey(1))
    state2 = jax.random.normal(k_s2, (batch2, state_dim), jnp.float32)
    action2 = jax.random.normal(k_a2, (batch2, act_dim), jnp.float32)

    p_bf16 = prepare_params(params, state_dim, compute_dtype=jnp.bfloat16)
    q2 = jax.block_until_ready(
        ddpg_critic_forward(state2, action2, p_bf16, block_b=128))
    ref2 = critic_reference(state2, action2, params)
    assert q2.shape == (batch2, 1)
    assert jnp.allclose(q2, ref2, atol=5e-2), float(jnp.max(jnp.abs(q2 - ref2)))

    print("KERNEL_OK")
</pallas_src>

<mosaic_0001>
module attributes {stable_mosaic.version = 11 : i64} {
  func.func @_critic_kernel(%arg0: i32, %arg1: memref<8x13xf32, #tpu.memory_space<vmem>>, %arg2: memref<8x4xf32, #tpu.memory_space<vmem>>, %arg3: memref<13x256xf32, #tpu.memory_space<vmem>>, %arg4: memref<4x256xf32, #tpu.memory_space<vmem>>, %arg5: memref<1x256xf32, #tpu.memory_space<vmem>>, %arg6: memref<256x256xf32, #tpu.memory_space<vmem>>, %arg7: memref<1x256xf32, #tpu.memory_space<vmem>>, %arg8: memref<1x256xf32, #tpu.memory_space<vmem>>, %arg9: memref<1x1xf32, #tpu.memory_space<vmem>>, %arg10: memref<8x1xf32, #tpu.memory_space<vmem>>) attributes {dimension_semantics = [#tpu.dimension_semantics<parallel>], iteration_bounds = array<i64: 1>, scalar_prefetch = 0 : i64, scratch_operands = 0 : i64, tpu.core_type = #tpu.core_type<tc>, window_params = [{transform_indices = @transform_0, window_bounds = array<i64: 8, 13>}, {transform_indices = @transform_1, window_bounds = array<i64: 8, 4>}, {pipeline_mode = #tpu.pipeline_mode<synchronous>, transform_indices = @transform_2, window_bounds = array<i64: 13, 256>}, {pipeline_mode = #tpu.pipeline_mode<synchronous>, transform_indices = @transform_3, window_bounds = array<i64: 4, 256>}, {pipeline_mode = #tpu.pipeline_mode<synchronous>, transform_indices = @transform_4, window_bounds = array<i64: 1, 256>}, {pipeline_mode = #tpu.pipeline_mode<synchronous>, transform_indices = @transform_5, window_bounds = array<i64: 256, 256>}, {pipeline_mode = #tpu.pipeline_mode<synchronous>, transform_indices = @transform_6, window_bounds = array<i64: 1, 256>}, {pipeline_mode = #tpu.pipeline_mode<synchronous>, transform_indices = @transform_7, window_bounds = array<i64: 1, 256>}, {pipeline_mode = #tpu.pipeline_mode<synchronous>, transform_indices = @transform_8, window_bounds = array<i64: 1, 1>}, {transform_indices = @transform_9, window_bounds = array<i64: 8, 1>}]} {
    %c0 = arith.constant 0 : index
    %c0_0 = arith.constant 0 : index
    %0 = vector.load %arg1[%c0, %c0_0] : memref<8x13xf32, #tpu.memory_space<vmem>>, vector<8x13xf32>
    %c0_1 = arith.constant 0 : index
    %c0_2 = arith.constant 0 : index
    %1 = vector.load %arg2[%c0_1, %c0_2] : memref<8x4xf32, #tpu.memory_space<vmem>>, vector<8x4xf32>
    %c0_3 = arith.constant 0 : index
    %c0_4 = arith.constant 0 : index
    %2 = vector.load %arg3[%c0_3, %c0_4] : memref<13x256xf32, #tpu.memory_space<vmem>>, vector<13x256xf32>
    %cst = arith.constant dense<0.000000e+00> : vector<8x256xf32>
    %3 = tpu.matmul %0, %2, %cst {dimension_numbers = #tpu.dot_dimension_numbers<[1], [0], [0], [1], [0, 0, 1, 1], [], []>} : vector<8x13xf32>, vector<13x256xf32>, vector<8x256xf32> -> vector<8x256xf32>
    %c0_5 = arith.constant 0 : index
    %c0_6 = arith.constant 0 : index
    %4 = vector.load %arg4[%c0_5, %c0_6] : memref<4x256xf32, #tpu.memory_space<vmem>>, vector<4x256xf32>
    %cst_7 = arith.constant dense<0.000000e+00> : vector<8x256xf32>
    %5 = tpu.matmul %1, %4, %cst_7 {dimension_numbers = #tpu.dot_dimension_numbers<[1], [0], [0], [1], [0, 0, 1, 1], [], []>} : vector<8x4xf32>, vector<4x256xf32>, vector<8x256xf32> -> vector<8x256xf32>
    %6 = arith.addf %3, %5 : vector<8x256xf32>
    %c0_8 = arith.constant 0 : index
    %c0_9 = arith.constant 0 : index
    %7 = vector.load %arg5[%c0_8, %c0_9] : memref<1x256xf32, #tpu.memory_space<vmem>>, vector<1x256xf32>
    %8 = vector.broadcast %7 : vector<1x256xf32> to vector<8x256xf32>
    %9 = arith.addf %6, %8 : vector<8x256xf32>
    %cst_10 = arith.constant 0.000000e+00 : f32
    %10 = vector.broadcast %cst_10 : f32 to vector<8x256xf32>
    %11 = arith.maximumf %9, %10 : vector<8x256xf32>
    %c0_11 = arith.constant 0 : index
    %c0_12 = arith.constant 0 : index
    %12 = vector.load %arg6[%c0_11, %c0_12] : memref<256x256xf32, #tpu.memory_space<vmem>>, vector<256x256xf32>
    %cst_13 = arith.constant dense<0.000000e+00> : vector<8x256xf32>
    %13 = tpu.matmul %11, %12, %cst_13 {dimension_numbers = #tpu.dot_dimension_numbers<[1], [0], [0], [1], [0, 0, 1, 1], [], []>} : vector<8x256xf32>, vector<256x256xf32>, vector<8x256xf32> -> vector<8x256xf32>
    %c0_14 = arith.constant 0 : index
    %c0_15 = arith.constant 0 : index
    %14 = vector.load %arg7[%c0_14, %c0_15] : memref<1x256xf32, #tpu.memory_space<vmem>>, vector<1x256xf32>
    %15 = vector.broadcast %14 : vector<1x256xf32> to vector<8x256xf32>
    %16 = arith.addf %13, %15 : vector<8x256xf32>
    %cst_16 = arith.constant 0.000000e+00 : f32
    %17 = vector.broadcast %cst_16 : f32 to vector<8x256xf32>
    %18 = arith.maximumf %16, %17 : vector<8x256xf32>
    %c0_17 = arith.constant 0 : index
    %c0_18 = arith.constant 0 : index
    %19 = vector.load %arg8[%c0_17, %c0_18] : memref<1x256xf32, #tpu.memory_space<vmem>>, vector<1x256xf32>
    %20 = vector.broadcast %19 : vector<1x256xf32> to vector<8x256xf32>
    %21 = arith.mulf %18, %20 : vector<8x256xf32>
    %cst_19 = arith.constant dense<0.000000e+00> : vector<8xf32>
    %22 = vector.multi_reduction <add>, %21, %cst_19 [1] : vector<8x256xf32> to vector<8xf32>
    %23 = vector.shape_cast %22 : vector<8xf32> to vector<8x1xf32>
    %c0_20 = arith.constant 0 : index
    %c0_21 = arith.constant 0 : index
    %24 = vector.load %arg9[%c0_20, %c0_21] : memref<1x1xf32, #tpu.memory_space<vmem>>, vector<1x1xf32>
    %25 = vector.broadcast %24 : vector<1x1xf32> to vector<8x1xf32>
    %26 = arith.addf %23, %25 : vector<8x1xf32>
    %c0_22 = arith.constant 0 : index
    %c0_23 = arith.constant 0 : index
    %27 = vector.load %arg10[%c0_22, %c0_23] : memref<8x1xf32, #tpu.memory_space<vmem>>, vector<8x1xf32>
    tpu.vector_store %arg10[%c0_22, %c0_23], %26 {strides = array<i32>} : memref<8x1xf32, #tpu.memory_space<vmem>>, vector<8x1xf32>,
    return
  }
  func.func @transform_0(%arg0: i32) -> (i32, i32) {
    %c0_i32 = arith.constant 0 : i32
    %c0_i32_0 = arith.constant 0 : i32
    return %arg0, %c0_i32 : i32, i32
  }
  func.func @transform_1(%arg0: i32) -> (i32, i32) {
    %c0_i32 = arith.constant 0 : i32
    %c0_i32_0 = arith.constant 0 : i32
    return %arg0, %c0_i32 : i32, i32
  }
  func.func @transform_2(%arg0: i32) -> (i32, i32) {
    %c0_i32 = arith.constant 0 : i32
    %c0_i32_0 = arith.constant 0 : i32
    %c0_i32_1 = arith.constant 0 : i32
    return %c0_i32, %c0_i32_0 : i32, i32
  }
  func.func @transform_3(%arg0: i32) -> (i32, i32) {
    %c0_i32 = arith.constant 0 : i32
    %c0_i32_0 = arith.constant 0 : i32
    %c0_i32_1 = arith.constant 0 : i32
    return %c0_i32, %c0_i32_0 : i32, i32
  }
  func.func @transform_4(%arg0: i32) -> (i32, i32) {
    %c0_i32 = arith.constant 0 : i32
    %c0_i32_0 = arith.constant 0 : i32
    %c0_i32_1 = arith.constant 0 : i32
    return %c0_i32, %c0_i32_0 : i32, i32
  }
  func.func @transform_5(%arg0: i32) -> (i32, i32) {
    %c0_i32 = arith.constant 0 : i32
    %c0_i32_0 = arith.constant 0 : i32
    %c0_i32_1 = arith.constant 0 : i32
    return %c0_i32, %c0_i32_0 : i32, i32
  }
  func.func @transform_6(%arg0: i32) -> (i32, i32) {
    %c0_i32 = arith.constant 0 : i32
    %c0_i32_0 = arith.constant 0 : i32
    %c0_i32_1 = arith.constant 0 : i32
    return %c0_i32, %c0_i32_0 : i32, i32
  }
  func.func @transform_7(%arg0: i32) -> (i32, i32) {
    %c0_i32 = arith.constant 0 : i32
    %c0_i32_0 = arith.constant 0 : i32
    %c0_i32_1 = arith.constant 0 : i32
    return %c0_i32, %c0_i32_0 : i32, i32
  }
  func.func @transform_8(%arg0: i32) -> (i32, i32) {
    %c0_i32 = arith.constant 0 : i32
    %c0_i32_0 = arith.constant 0 : i32
    %c0_i32_1 = arith.constant 0 : i32
    return %c0_i32, %c0_i32_0 : i32, i32
  }
  func.func @transform_9(%arg0: i32) -> (i32, i32) {
    %c0_i32 = arith.constant 0 : i32
    %c0_i32_0 = arith.constant 0 : i32
    return %arg0, %c0_i32 : i32, i32
  }
}

</mosaic_0001>

<bundles_post_ra>
// kernel: tpu_custom_call.1
= control target key start
LH: loop header
LB: loop body
LE: loop exit
PB: predicated region body
PF: predicated region fallthrough
CT: control target
= control target key end

     0   :  { %s551_s0 = inlined_call_operand.vmem [shape: f32[8,13], index: 0, kind: input, shape index: {}]   ;;  %s552_s1 = inlined_call_operand.vmem [shape: f32[8,4], index: 1, kind: input, shape index: {}]   ;;  %s553_s2 = inlined_call_operand.hbm [shape: f32[13,256], index: 2, kind: input, shape index: {}]   ;;  %s554_s3 = inlined_call_operand.vmem [shape: f32[4,256], index: 3, kind: input, shape index: {}]   ;;  %s555_s4 = inlined_call_operand.hbm [shape: f32[1,256], index: 4, kind: input, shape index: {}]   ;;  %s556_s5 = inlined_call_operand.hbm [shape: f32[256,256], index: 5, kind: input, shape index: {}]   ;;  %s557_s6 = inlined_call_operand.vmem [shape: f32[1,256], index: 6, kind: input, shape index: {}]   ;;  %s558_s7 = inlined_call_operand.vmem [shape: f32[1,256], index: 7, kind: input, shape index: {}]   ;;  %s559_s8 = inlined_call_operand.<no memory space> [shape: f32[1,1], index: 8, kind: input, shape index: {}]   ;;  %s560_s9 = inlined_call_operand.vmem [shape: f32[8,1], index: 9, kind: output, shape index: {}]  }
   0x1   :  { %v14_v0 = vstv %s559_s8 }
   0x2   :  { %15 = vst [vmem:[#allocation2] sm:$0x1] %v14_v0 }
   0x3   :  { %16 = vsyncpa [#allocation4], 0 }
   0x4   :  { %17 = vsyncpa [#allocation6], 0  ;;  %s42_s13 = sshll.u32 %s555_s4, 4  ;;  %s466_s14 = smov [#allocation5]   ;;  %s43_s13 = int_to_ptr.hbm [resolvable:$true] %s42_s13 }
   0x5   :  { %s44_s15 = sshll.u32 %s466_s14, 4  ;;  %s26_s18 = sshll.u32 %s553_s2, 4  ;;  %s45_s15 = int_to_ptr.vmem [resolvable:$true] %s44_s15  ;;  %s27_s18 = int_to_ptr.hbm [resolvable:$true] %s26_s18 }
   0x6   :  { %47 = dma.hbm_to_vmem [thread:$0]  %s43_s13, 32, %s45_s15, [#allocation6]  }
   0x7   :  { %s467_s19 = smov [#allocation3]   ;;  %s468_s8 = smov 256  }
   0x8   :  { %s28_s20 = sshll.u32 %s467_s19, 4  ;;  %s469_s21 = smov 16   ;;  %s29_s20 = int_to_ptr.vmem [resolvable:$true] %s28_s20 }
   0x9   :  { %34 = dma.hbm_to_vmem [thread:$0]  %s27_s18, 512, %s29_s20, [#allocation4], %s468_s8, %s468_s8, %s469_s21  }
   0xa   :  { %s52_s4 = sshll.u32 %s556_s5, 4  ;;  %s470_s24 = smov [#allocation7]   ;;  %s53_s4 = int_to_ptr.hbm [resolvable:$true] %s52_s4 }
   0xb   :  { %s54_s25 = sshll.u32 %s470_s24, 4  ;;  %s55_s25 = int_to_ptr.vmem [resolvable:$true] %s54_s25 }
   0xc   :  { %60 = dma.hbm_to_vmem [thread:$0]  %s53_s4, 8192, %s55_s25, [#allocation6], %s468_s8, %s468_s8, %s469_s21  }
   0xd   :  { %462 = dma.done.wait [#allocation4], 512  }
   0xe   :  { %463 = vsyncadd [#allocation4], 4294966784 }
   0xf   :  { %464 = dma.done.wait [#allocation6], 8224  }
  0x10   :  { %465 = vsyncadd [#allocation6], 4294959072  ;;  %vm143_vm0 = vcmask 1044480   ;;  %v83_v1 = vld [vmem:[#allocation3 + $0x10] sm:$0x1f]  ;;  %v81_v2 = vld [vmem:[#allocation3] sm:$0xff] }
  0x11   :  { %v84_v3 = vld [vmem:[#allocation3 + $0x18] sm:$0x1f]  ;;  %380 = vmatpush.msk.msra.mxu2 %vm143_vm0, %v83_v1  ;;  %vm139_vm1 = vcmask 105472   ;;  %v82_v5 = vld [vmem:[#allocation3 + $0x8] sm:$0xff]  ;;  %vm94_vm2 = vcmask 1043456   ;;  %vm90_vm3 = vcmask 31744  }
  0x12   :  { %382 = vmatpush.msk.msra.mxu3 %vm143_vm0, %v84_v3  ;;  %v79_v4 = vld [vmem:[%s551_s0] sm:$0xff]  ;;  %v229_v8 = vld [vmem:[#allocation7 + $0xe8] sm:$0xff]  ;;  %v228_v20 = vld [vmem:[#allocation7 + $0xe0] sm:$0xff]  ;;  %vm368_vm4 = vcmask 7168  }
  0x13   :  { %v85_v6 = vld [vmem:[%s554_s3] sm:$0xff]  ;;  %165 = vmatpush.msra.mxu2 %v81_v2  ;;  %v261_v10 = vld [vmem:[#allocation7 + $0x1e8] sm:$0xff]  ;;  %v260_v21 = vld [vmem:[#allocation7 + $0x1e0] sm:$0xff] }
  0x14   :  { %87 = vst [vmem:[#allocation1] ss:$2 sm:$0xff] %v85_v6  ;;  %v231_v7 = vld [vmem:[#allocation7 + $0xf8] sm:$0xff]  ;;  %185 = vmatpush.msra.mxu3 %v82_v5  ;;  %381 = vmatmul.msk.f32.vlgmr.msra.gmra.mxu2 %vm139_vm1, %v79_v4  ;;  %v230_v14 = vld [vmem:[#allocation7 + $0xf0] sm:$0xff]  ;;  %v225_v18 = vld [vmem:[#allocation7 + $0xc8] sm:$0xff] }
  0x15   :  { %383 = vmatmul.msk.f32.vlgmr.msra.gmra.mxu3 %vm139_vm1, %v79_v4  ;;  %v263_v9 = vld [vmem:[#allocation7 + $0x1f8] sm:$0xff]  ;;  %310 = vmatpush.msrb.mxu2 %v231_v7  ;;  %v262_v15 = vld [vmem:[#allocation7 + $0x1f0] sm:$0xff]  ;;  %v257_v19 = vld [vmem:[#allocation7 + $0x1c8] sm:$0xff] }
  0x16   :  { %330 = vmatpush.msrb.mxu3 %v263_v9  ;;  %v227_v11 = vld [vmem:[#allocation7 + $0xd8] sm:$0xff]  ;;  %v226_v24 = vld [vmem:[#allocation7 + $0xd0] sm:$0xff]  ;;  %v221_v26 = vld [vmem:[#allocation7 + $0xa8] sm:$0xff] }
  0x17   :  { %v259_v12 = vld [vmem:[#allocation7 + $0x1d8] sm:$0xff]  ;;  %311 = vmatpush.msrb.mxu2 %v229_v8  ;;  %v258_v25 = vld [vmem:[#allocation7 + $0x1d0] sm:$0xff]  ;;  %v253_v27 = vld [vmem:[#allocation7 + $0x1a8] sm:$0xff] }
  0x18   :  { %331 = vmatpush.msrb.mxu3 %v261_v10  ;;  %v80_v13 = vld [vmem:[%s552_s1] sm:$0xff]  ;;  %v224_v28 = vld [vmem:[#allocation7 + $0xc0] sm:$0xff]  ;;  %v217_v34 = vld [vmem:[#allocation7 + $0x88] sm:$0xff] }
  0x19   :  { %312 = vmatpush.msrb.mxu2 %v227_v11  ;;  %v223_v22 = vld [vmem:[#allocation7 + $0xb8] sm:$0xff]  ;;  %v256_v29 = vld [vmem:[#allocation7 + $0x1c0] sm:$0xff]  ;;  %v222_v32 = vld [vmem:[#allocation7 + $0xb0] sm:$0xff] }
  0x1a   :  { %332 = vmatpush.msrb.mxu3 %v259_v12  ;;  %v255_v23 = vld [vmem:[#allocation7 + $0x1b8] sm:$0xff]  ;;  %v254_v33 = vld [vmem:[#allocation7 + $0x1b0] sm:$0xff]  ;;  %v249_v35 = vld [vmem:[#allocation7 + $0x188] sm:$0xff] }
  0x1b   :  { %v88_v16 = vld.sshfl [vmem:[#allocation1] sm:$0xff pattern:$0x75316420]  ;;  %v89_v17 = vld.sshfl [vmem:[#allocation1 + $0x8] sm:$0xff pattern:$0x75316420]  ;;  %313 = vmatpush.msrb.mxu2 %v225_v18 }
  0x1c   :  { %376 = vmatpush.msk.msra.mxu0 %vm94_vm2, %v88_v16  ;;  %378 = vmatpush.msk.msra.mxu1 %vm94_vm2, %v89_v17  ;;  %v219_v30 = vld [vmem:[#allocation7 + $0x98] sm:$0xff]  ;;  %v220_v36 = vld [vmem:[#allocation7 + $0xa0] sm:$0xff]  ;;  %v218_v40 = vld [vmem:[#allocation7 + $0x90] sm:$0xff] }
  0x1d   :  { %377 = vmatmul.msk.f32.vlgmr.msra.gmra.mxu0 %vm90_vm3, %v80_v13  ;;  %379 = vmatmul.msk.f32.vlgmr.msra.gmra.mxu1 %vm90_vm3, %v80_v13  ;;  %v251_v31 = vld [vmem:[#allocation7 + $0x198] sm:$0xff]  ;;  %v252_v37 = vld [vmem:[#allocation7 + $0x1a0] sm:$0xff]  ;;  %v250_v41 = vld [vmem:[#allocation7 + $0x190] sm:$0xff] }
  0x1e   :  { %270 = vmatpush.msrb.mxu0 %v230_v14  ;;  %290 = vmatpush.msrb.mxu1 %v262_v15  ;;  %v215_v38 = vld [vmem:[#allocation7 + $0x78] sm:$0xff]  ;;  %v213_v42 = vld [vmem:[#allocation7 + $0x68] sm:$0xff]  ;;  %v216_v44 = vld [vmem:[#allocation7 + $0x80] sm:$0xff] }
  0x1f   :  { %333 = vmatpush.msrb.mxu3 %v257_v19  ;;  %314 = vmatpush.msrb.mxu2 %v223_v22  ;;  %v247_v39 = vld [vmem:[#allocation7 + $0x178] sm:$0xff]  ;;  %v245_v43 = vld [vmem:[#allocation7 + $0x168] sm:$0xff]  ;;  %v248_v45 = vld [vmem:[#allocation7 + $0x180] sm:$0xff] }
  0x20   :  { %271 = vmatpush.msrb.mxu0 %v228_v20  ;;  %291 = vmatpush.msrb.mxu1 %v260_v21  ;;  %v211_v46 = vld [vmem:[#allocation7 + $0x58] sm:$0xff]  ;;  %v214_v48 = vld [vmem:[#allocation7 + $0x70] sm:$0xff]  ;;  %v209_v50 = vld [vmem:[#allocation7 + $0x48] sm:$0xff] }
  0x21   :  { %334 = vmatpush.msrb.mxu3 %v255_v23  ;;  %315 = vmatpush.msrb.mxu2 %v221_v26  ;;  %v243_v47 = vld [vmem:[#allocation7 + $0x158] sm:$0xff]  ;;  %v246_v49 = vld [vmem:[#allocation7 + $0x170] sm:$0xff]  ;;  %v212_v51 = vld [vmem:[#allocation7 + $0x60] sm:$0xff] }
  0x22   :  { %272 = vmatpush.msrb.mxu0 %v226_v24  ;;  %292 = vmatpush.msrb.mxu1 %v258_v25  ;;  %v244_v52 = vld [vmem:[#allocation7 + $0x160] sm:$0xff]  ;;  %v210_v53 = vld [vmem:[#allocation7 + $0x50] sm:$0xff]  ;;  %v207_v58 = vld [vmem:[#allocation7 + $0x38] sm:$0xff] }
  0x23   :  { %335 = vmatpush.msrb.mxu3 %v253_v27  ;;  %316 = vmatpush.msrb.mxu2 %v219_v30  ;;  %v242_v54 = vld [vmem:[#allocation7 + $0x150] sm:$0xff]  ;;  %v208_v55 = vld [vmem:[#allocation7 + $0x40] sm:$0xff]  ;;  %v241_v59 = vld [vmem:[#allocation7 + $0x148] sm:$0xff] }
  0x24   :  { %273 = vmatpush.msrb.mxu0 %v224_v28  ;;  %293 = vmatpush.msrb.mxu1 %v256_v29  ;;  %v206_v56 = vld [vmem:[#allocation7 + $0x30] sm:$0xff]  ;;  %v240_v57 = vld [vmem:[#allocation7 + $0x140] sm:$0xff]  ;;  %v205_v62 = vld [vmem:[#allocation7 + $0x28] sm:$0xff] }
  0x25   :  { %336 = vmatpush.msrb.mxu3 %v251_v31  ;;  %317 = vmatpush.msrb.mxu2 %v217_v34  ;;  %v204_v60 = vld [vmem:[#allocation7 + $0x20] sm:$0xff]  ;;  %v238_v61 = vld [vmem:[#allocation7 + $0x130] sm:$0xff]  ;;  %v239_v63 = vld [vmem:[#allocation7 + $0x138] sm:$0xff] }
  0x26   :  { %274 = vmatpush.msrb.mxu0 %v222_v32  ;;  %294 = vmatpush.msrb.mxu1 %v254_v33  ;;  %v202_v0 = vld [vmem:[#allocation7 + $0x10] sm:$0xff]  ;;  %v236_v1 = vld [vmem:[#allocation7 + $0x120] sm:$0xff]  ;;  %v203_v2 = vld [vmem:[#allocation7 + $0x18] sm:$0xff] }
  0x27   :  { %337 = vmatpush.msrb.mxu3 %v249_v35  ;;  %318 = vmatpush.msrb.mxu2 %v215_v38  ;;  %v237_v3 = vld [vmem:[#allocation7 + $0x128] sm:$0xff]  ;;  %v200_v4 = vld [vmem:[#allocation7] sm:$0xff]  ;;  %v234_v5 = vld [vmem:[#allocation7 + $0x110] sm:$0xff] }
  0x28   :  { %275 = vmatpush.msrb.mxu0 %v220_v36  ;;  %295 = vmatpush.msrb.mxu1 %v252_v37  ;;  %v201_v6 = vld [vmem:[#allocation7 + $0x8] sm:$0xff]  ;;  %v235_v7 = vld [vmem:[#allocation7 + $0x118] sm:$0xff]  ;;  %v232_v8 = vld [vmem:[#allocation7 + $0x100] sm:$0xff] }
  0x29   :  { %338 = vmatpush.msrb.mxu3 %v247_v39  ;;  %319 = vmatpush.msrb.mxu2 %v213_v42  ;;  %v233_v9 = vld [vmem:[#allocation7 + $0x108] sm:$0xff]  ;;  %v190_v10 = vld [vmem:[#allocation5] sm:$0x3]  ;;  %v264_v23 = vld [vmem:[%s557_s6] sm:$0x3] }
  0x2a   :  { %276 = vmatpush.msrb.mxu0 %v218_v40  ;;  %296 = vmatpush.msrb.mxu1 %v250_v41  ;;  %v192_v12 = vperm.slane %v190_v10, 0  ;;  %v193_v14 = vperm.slane %v190_v10, 1  ;;  %v266_v24 = vperm.slane %v264_v23, 0  ;;  %v267_v28 = vperm.slane %v264_v23, 1  ;;  %v352_v31 = vld [vmem:[%s558_s7] sm:$0x3] }
  0x2b   :  { %339 = vmatpush.msrb.mxu3 %v245_v43  ;;  %320 = vmatpush.msrb.mxu2 %v211_v46  ;;  %v354_v36 = vperm.slane %v352_v31, 0  ;;  %v355_v37 = vperm.slane %v352_v31, 1  ;;  %v389_v42 = vld [vmem:[#allocation2] ss:$0 sm:$0xff] }
  0x2c   :  { %277 = vmatpush.msrb.mxu0 %v216_v44  ;;  %297 = vmatpush.msrb.mxu1 %v248_v45 }
  0x2d   :  { %340 = vmatpush.msrb.mxu3 %v243_v47  ;;  %321 = vmatpush.msrb.mxu2 %v209_v50 }
  0x2e   :  { %278 = vmatpush.msrb.mxu0 %v214_v48  ;;  %298 = vmatpush.msrb.mxu1 %v246_v49 }
  0x2f   :  { %322 = vmatpush.msrb.mxu2 %v207_v58  ;;  %341 = vmatpush.msrb.mxu3 %v241_v59 }
  0x30   :  { %279 = vmatpush.msrb.mxu0 %v212_v51  ;;  %299 = vmatpush.msrb.mxu1 %v244_v52 }
  0x31   :  { %323 = vmatpush.msrb.mxu2 %v205_v62  ;;  %342 = vmatpush.msrb.mxu3 %v239_v63 }
  0x32   :  { %280 = vmatpush.msrb.mxu0 %v210_v53  ;;  %300 = vmatpush.msrb.mxu1 %v242_v54 }
  0x33   :  { %324 = vmatpush.msrb.mxu2 %v203_v2  ;;  %343 = vmatpush.msrb.mxu3 %v237_v3 }
  0x34   :  { %281 = vmatpush.msrb.mxu0 %v208_v55  ;;  %301 = vmatpush.msrb.mxu1 %v240_v57 }
  0x35   :  { %325 = vmatpush.msrb.mxu2 %v201_v6  ;;  %344 = vmatpush.msrb.mxu3 %v235_v7 }
  0x36   :  { %282 = vmatpush.msrb.mxu0 %v206_v56  ;;  %302 = vmatpush.msrb.mxu1 %v238_v61 }
  0x37   :  { %345 = vmatpush.msrb.mxu3 %v233_v9 }
  0x38   :  { %283 = vmatpush.msrb.mxu0 %v204_v60  ;;  %303 = vmatpush.msrb.mxu1 %v236_v1 }
  0x3a   :  { %284 = vmatpush.msrb.mxu0 %v202_v0  ;;  %304 = vmatpush.msrb.mxu1 %v234_v5 }
  0x3c   :  { %285 = vmatpush.msrb.mxu0 %v200_v4  ;;  %305 = vmatpush.msrb.mxu1 %v232_v8 }
  0x97   :  { %v167_v11 = vpop.f32.mrf.mxu2 }
  0x98   :  { %v187_v13 = vpop.f32.mrf.mxu3 }
  0x9a   :  { %v116_v15 = vpop.f32.mrf.mxu0  ;;  %v136_v16 = vpop.f32.mrf.mxu1 }
  0x9b   :  { %v168_v17 = vadd.f32 %v167_v11, %v116_v15  ;;  %v188_v18 = vadd.f32 %v187_v13, %v136_v16 }
  0x9d   :  { %v196_v19 = vadd.f32 %v192_v12, %v168_v17  ;;  %v197_v20 = vadd.f32 %v193_v14, %v188_v18 }
  0x9f   :  { %v198_v21 = vmax.f32 %v196_v19, 0.0  ;;  %v199_v22 = vmax.f32 %v197_v20, 0.0 }
  0xa1   :  { %286 = vmatmul.f32.vlgmr.msrb.gmra.mxu0 %v198_v21  ;;  %326 = vmatmul.f32.vlgmr.msrb.gmra.mxu2 %v198_v21 }
  0xa2   :  { %306 = vmatmul.f32.vlgmr.msrb.gmra.mxu1 %v199_v22  ;;  %346 = vmatmul.f32.vlgmr.msrb.gmra.mxu3 %v199_v22 }
 0x11e   :  { %v287_v25 = vpop.f32.mrf.mxu0 }
 0x11f   :  { %v288_v26 = vadd.f32 %v287_v25, %v266_v24  ;;  %v307_v27 = vpop.f32.mrf.mxu1 }
 0x121   :  { %v308_v29 = vadd.f32 %v307_v27, %v288_v26 }
 0x123   :  { %v350_v34 = vmax.f32 %v308_v29, 0.0 }
 0x124   :  { %v327_v30 = vpop.f32.mrf.mxu2 }
 0x125   :  { %v328_v32 = vadd.f32 %v327_v30, %v267_v28  ;;  %v347_v33 = vpop.f32.mrf.mxu3  ;;  %v358_v39 = vmul.f32 %v354_v36, %v350_v34 }
 0x127   :  { %v348_v35 = vadd.f32 %v347_v33, %v328_v32 }
 0x129   :  { %v351_v38 = vmax.f32 %v348_v35, 0.0 }
 0x12b   :  { %v359_v40 = vmul.f32 %v355_v37, %v351_v38 }
 0x12d   :  { %v360_v41 = vadd.f32 %v359_v40, %v358_v39 }
 0x12f   :  { %361 = vadd.xlane.f32.xlu0 %v360_v41 }
 0x1a2   :  { %v362_v43 = vpop.xlane.xlu0 %361 }
 0x1a3   :  { %v367_v44 = vadd.f32 %v389_v42, %v362_v43 }
 0x1a5   :  { %369 = vst.msk [vmem:[%s560_s9] sm:$0xff] %vm368_vm4, %v367_v44 }
 0x1a6   :  { %374 = vsyncpa [#allocation4], 1 }
 0x1a7   :  { %375 = vsyncpa [#allocation6], 1 }

</bundles_post_ra>
